<compile_context>
chip_gen: v7x
topology: tpu7x:2x2x1
jax: 0.10.0
libtpu: 0.0.40
codegen_flags: <defaults>
</compile_context>

<pallas_src>
import functools

import jax
import jax.numpy as jnp
from jax.experimental import pallas as pl
from jax.experimental.pallas import tpu as pltpu


def se_kernel(x_ref, w1_ref, w2_ref, o_ref, *, inv_hw, mul_in_io_dtype):
    # x_ref/o_ref: (BT, C, HW) block; w1_ref/w2_ref: (C, hidden).
    # Squeeze: global average pool over the lane (spatial) axis.
    # Cast folded into the reduce; no block-sized f32 temp kept alive.
    pooled = jnp.sum(x_ref[...].astype(jnp.float32), axis=-1, keepdims=True) * inv_hw  # (BT,C,1)
    # Excitation stays on VPU/XLU (hidden is tiny; an MXU push would be waste).
    h = jnp.sum(pooled * w1_ref[...][None], axis=1, keepdims=True)        # (BT,1,hidden)
    h = jnp.maximum(h, 0.0)                                               # ReLU
    y = jnp.sum(w2_ref[...][None] * h, axis=-1, keepdims=True)            # (BT,C,1)
    scale = jax.nn.sigmoid(y)                                             # f32
    # Channel-wise rescale: re-read x_ref instead of holding an f32 copy of
    # the whole block across the FC math.
    if mul_in_io_dtype:
        # f32 I/O, or bf16 I/O on chips with bf16 VALU (v6e/v7x).
        o_ref[...] = x_ref[...] * scale.astype(o_ref.dtype)
    else:
        # v5e / unknown chip with sub-32-bit I/O: no bf16 VALU -> f32 rescale.
        o_ref[...] = (x_ref[...].astype(jnp.float32) * scale).astype(o_ref.dtype)


def _tpu_generation():
    """Best-effort TPU generation from device_kind (0 if unknown)."""
    try:
        kind = jax.devices()[0].device_kind.lower()
    except Exception:
        return 0
    if "v7" in kind or "7x" in kind:
        return 7
    if "v6" in kind or "trillium" in kind:
        return 6
    if "v5" in kind:
        return 5
    if "v4" in kind:
        return 4
    return 0


def _chip_knobs(gen):
    """(target block bytes, vmem cap bytes, min grid steps, bf16 VALU ok)."""
    if gen >= 7:
        # 64 MiB physical VMEM, 2 TensorCores -> keep >= 2 steps per TC.
        return 8 << 20, 48 << 20, 4, True
    if gen == 6:
        return 12 << 20, 96 << 20, 2, True
    if gen in (4, 5):
        return 12 << 20, 96 << 20, 2, False
    # Unknown chip: conservative.
    return 6 << 20, 48 << 20, 2, False


def _choose_bt(b, per_sample_bytes, target_bytes, min_grid_steps):
    """Largest BT with BT*per_sample <= target, keeping >= min_grid_steps steps.

    No divisibility requirement: the grid uses cdiv and the ragged last batch
    block is masked (per-sample math is independent, so this is safe).
    """
    bt = int(max(1, min(b, target_bytes // max(per_sample_bytes, 1))))
    while bt > 1 and pl.cdiv(b, bt) < min_grid_steps:
        bt -= 1
    return bt


def se_layer(x, w1, w2):
    """x: (B, C, H, W); w1: (hidden, C) = fc1.weight; w2: (C, hidden) = fc2.weight."""
    b, c, h, w = x.shape
    hw = h * w
    hidden = w1.shape[0]

    gen = _tpu_generation()
    target_bytes, vmem_cap, min_steps, bf16_valu = _chip_knobs(gen)

    io_dtype = x.dtype
    if io_dtype == jnp.float32:
        mul_in_io_dtype = True          # identical to the f32 path
    else:
        mul_in_io_dtype = bool(bf16_valu and io_dtype == jnp.bfloat16)

    x_flat = x.reshape(b, c, hw)

    # Lane densification: pad HW up to a multiple of 128 when cheap (<= 25%
    # overhead).  Zeros contribute nothing to the sum; mean uses true 1/HW.
    lane = 128
    pad = 0
    hw_padded = hw
    if hw % lane != 0:
        cand = ((hw + lane - 1) // lane) * lane
        if cand - hw <= max(hw // 4, lane // 8):
            pad = cand - hw
            hw_padded = cand
            x_flat = jnp.pad(x_flat, ((0, 0), (0, 0), (0, pad)))
        # else: TODO(synk): (B, HW, C) layout with C on lanes for very
        # lane-sparse spatial sizes (7x7 etc.) instead of padding.

    w1k = w1.T.astype(jnp.float32)      # (C, hidden)
    w2k = w2.astype(jnp.float32)        # (C, hidden)

    itemsize = jnp.dtype(io_dtype).itemsize
    per_sample_bytes = c * hw_padded * itemsize
    bt = _choose_bt(b, per_sample_bytes, target_bytes, min_steps)
    block_bytes = bt * per_sample_bytes
    w_bytes = 2 * c * hidden * 4
    # Honest budget: in+out double-buffered, weights, plus the f32
    # intermediate only when the rescale path widens a sub-32-bit block.
    internal_bytes = 0 if (mul_in_io_dtype or itemsize >= 4) else bt * c * hw_padded * 4
    vmem_limit = int(min(vmem_cap,
                         max(32 << 20,
                             4 * block_bytes + 4 * w_bytes + internal_bytes + (2 << 20))))

    kernel = functools.partial(se_kernel,
                               inv_hw=1.0 / float(hw),
                               mul_in_io_dtype=mul_in_io_dtype)

    out_flat = pl.pallas_call(
        kernel,
        out_shape=jax.ShapeDtypeStruct((b, c, hw_padded), io_dtype),
        grid_spec=pltpu.PrefetchScalarGridSpec(
            num_scalar_prefetch=0,
            grid=(pl.cdiv(b, bt),),
            in_specs=[
                pl.BlockSpec((bt, c, hw_padded), lambda i: (i, 0, 0)),
                pl.BlockSpec((c, hidden), lambda i: (0, 0)),
                pl.BlockSpec((c, hidden), lambda i: (0, 0)),
            ],
            out_specs=pl.BlockSpec((bt, c, hw_padded), lambda i: (i, 0, 0)),
        ),
        compiler_params=pltpu.CompilerParams(
            dimension_semantics=("parallel",),
            vmem_limit_bytes=vmem_limit,
        ),
    )(x_flat, w1k, w2k)

    if pad:
        out_flat = out_flat[:, :, :hw]
    return out_flat.reshape(b, c, h, w)


def se_layer_ref(x, w1, w2):
    """Pure-JAX reference mirroring the PyTorch forward (f32 math)."""
    xf = x.astype(jnp.float32)
    y = jnp.mean(xf, axis=(2, 3))                 # (b, c) adaptive avg pool -> 1x1
    y = jnp.maximum(y @ w1.T, 0.0)                # fc1 + relu
    y = jax.nn.sigmoid(y @ w2.T)                  # fc2 + sigmoid
    return xf * y[:, :, None, None]


if __name__ == "__main__":
    # channel=32, reduction=16 -> hidden=2 (matches the nn.Linear shapes in __init__)
    B, C, H, W = 2, 32, 16, 16
    reduction = 16
    hidden = C // reduction

    key = jax.random.PRNGKey(0)
    kx, k1, k2, kx2, kx3, kx4 = jax.random.split(key, 6)
    x = jax.random.normal(kx, (B, C, H, W), dtype=jnp.float32)
    # PyTorch Linear weight shapes: (out_features, in_features)
    w1 = jax.random.normal(k1, (hidden, C), dtype=jnp.float32) * 0.2   # fc1.weight
    w2 = jax.random.normal(k2, (C, hidden), dtype=jnp.float32) * 0.2   # fc2.weight

    # --- f32, small batch ---
    out = jax.block_until_ready(se_layer(x, w1, w2))
    ref = se_layer_ref(x, w1, w2)
    assert out.shape == (B, C, H, W)
    assert jnp.allclose(out, ref, atol=1e-5, rtol=1e-5), "f32 mismatch vs reference"

    # --- f32, larger batch (exercises BT > 1 multi-sample blocks) ---
    B2 = 16
    x2 = jax.random.normal(kx2, (B2, C, H, W), dtype=jnp.float32)
    out2 = jax.block_until_ready(se_layer(x2, w1, w2))
    assert jnp.allclose(out2, se_layer_ref(x2, w1, w2), atol=1e-5, rtol=1e-5), \
        "batched f32 mismatch"

    # --- ragged batch (grid = cdiv, masked last block) ---
    B3 = 5
    x3 = jax.random.normal(kx3, (B3, C, H, W), dtype=jnp.float32)
    out3 = jax.block_until_ready(se_layer(x3, w1, w2))
    assert jnp.allclose(out3, se_layer_ref(x3, w1, w2), atol=1e-5, rtol=1e-5), \
        "ragged-batch f32 mismatch"

    # --- H*W not a multiple of 128 (14*16=224 -> lane-padded to 256) ---
    x4 = jax.random.normal(kx4, (4, C, 14, 16), dtype=jnp.float32)
    out4 = jax.block_until_ready(se_layer(x4, w1, w2))
    assert jnp.allclose(out4, se_layer_ref(x4, w1, w2), atol=1e-5, rtol=1e-5), \
        "padded-HW f32 mismatch"

    # --- bf16 I/O (half the HBM traffic; f32 pooling/FC math inside) ---
    x_bf16 = x2.astype(jnp.bfloat16)
    out_bf16 = jax.block_until_ready(se_layer(x_bf16, w1, w2))
    ref_bf16 = se_layer_ref(x_bf16, w1, w2)   # f32 reference on bf16-cast input
    assert out_bf16.dtype == jnp.bfloat16
    assert jnp.allclose(out_bf16.astype(jnp.float32), ref_bf16, atol=5e-2, rtol=5e-2), \
        "bf16 mismatch vs reference"

    print("KERNEL_OK")
</pallas_src>

<mosaic_0001>
module attributes {stable_mosaic.version = 11 : i64} {
  func.func @se_kernel(%arg0: i32, %arg1: memref<1x32x256xf32, #tpu.memory_space<vmem>>, %arg2: memref<32x2xf32, #tpu.memory_space<vmem>>, %arg3: memref<32x2xf32, #tpu.memory_space<vmem>>, %arg4: memref<1x32x256xf32, #tpu.memory_space<vmem>>) attributes {dimension_semantics = [#tpu.dimension_semantics<parallel>], iteration_bounds = array<i64: 2>, scalar_prefetch = 0 : i64, scratch_operands = 0 : i64, tpu.core_type = #tpu.core_type<tc>, window_params = [{transform_indices = @transform_0, window_bounds = array<i64: 1, 32, 256>}, {pipeline_mode = #tpu.pipeline_mode<synchronous>, transform_indices = @transform_1, window_bounds = array<i64: 32, 2>}, {pipeline_mode = #tpu.pipeline_mode<synchronous>, transform_indices = @transform_2, window_bounds = array<i64: 32, 2>}, {transform_indices = @transform_3, window_bounds = array<i64: 1, 32, 256>}]} {
    %c0 = arith.constant 0 : index
    %c0_0 = arith.constant 0 : index
    %c0_1 = arith.constant 0 : index
    %0 = vector.load %arg1[%c0, %c0_0, %c0_1] : memref<1x32x256xf32, #tpu.memory_space<vmem>>, vector<1x32x256xf32>
    %cst = arith.constant dense<0.000000e+00> : vector<1x32xf32>
    %1 = vector.multi_reduction <add>, %0, %cst [2] : vector<1x32x256xf32> to vector<1x32xf32>
    %2 = vector.shape_cast %1 : vector<1x32xf32> to vector<1x32x1xf32>
    %cst_2 = arith.constant 3.906250e-03 : f32
    %3 = vector.broadcast %cst_2 : f32 to vector<1x32x1xf32>
    %4 = arith.mulf %2, %3 : vector<1x32x1xf32>
    %c0_3 = arith.constant 0 : index
    %c0_4 = arith.constant 0 : index
    %5 = vector.load %arg2[%c0_3, %c0_4] : memref<32x2xf32, #tpu.memory_space<vmem>>, vector<32x2xf32>
    %6 = vector.shape_cast %5 : vector<32x2xf32> to vector<1x32x2xf32>
    %7 = vector.broadcast %4 : vector<1x32x1xf32> to vector<1x32x2xf32>
    %8 = arith.mulf %7, %6 : vector<1x32x2xf32>
    %cst_5 = arith.constant dense<0.000000e+00> : vector<1x2xf32>
    %9 = vector.multi_reduction <add>, %8, %cst_5 [1] : vector<1x32x2xf32> to vector<1x2xf32>
    %10 = vector.shape_cast %9 : vector<1x2xf32> to vector<1x1x2xf32>
    %cst_6 = arith.constant 0.000000e+00 : f32
    %11 = vector.broadcast %cst_6 : f32 to vector<1x1x2xf32>
    %12 = arith.maximumf %10, %11 : vector<1x1x2xf32>
    %c0_7 = arith.constant 0 : index
    %c0_8 = arith.constant 0 : index
    %13 = vector.load %arg3[%c0_7, %c0_8] : memref<32x2xf32, #tpu.memory_space<vmem>>, vector<32x2xf32>
    %14 = vector.shape_cast %13 : vector<32x2xf32> to vector<1x32x2xf32>
    %15 = vector.broadcast %12 : vector<1x1x2xf32> to vector<1x32x2xf32>
    %16 = arith.mulf %14, %15 : vector<1x32x2xf32>
    %cst_9 = arith.constant dense<0.000000e+00> : vector<1x32xf32>
    %17 = vector.multi_reduction <add>, %16, %cst_9 [2] : vector<1x32x2xf32> to vector<1x32xf32>
    %18 = vector.shape_cast %17 : vector<1x32xf32> to vector<1x32x1xf32>
    %19 = arith.negf %18 : vector<1x32x1xf32>
    %20 = math.exp %19 : vector<1x32x1xf32>
    %cst_10 = arith.constant 1.000000e+00 : f32
    %21 = vector.broadcast %cst_10 : f32 to vector<1x32x1xf32>
    %22 = arith.addf %21, %20 : vector<1x32x1xf32>
    %23 = arith.divf %21, %22 : vector<1x32x1xf32>
    %c0_11 = arith.constant 0 : index
    %c0_12 = arith.constant 0 : index
    %c0_13 = arith.constant 0 : index
    %24 = vector.load %arg1[%c0_11, %c0_12, %c0_13] : memref<1x32x256xf32, #tpu.memory_space<vmem>>, vector<1x32x256xf32>
    %25 = vector.broadcast %23 : vector<1x32x1xf32> to vector<1x32x256xf32>
    %26 = arith.mulf %24, %25 : vector<1x32x256xf32>
    %c0_14 = arith.constant 0 : index
    %c0_15 = arith.constant 0 : index
    %c0_16 = arith.constant 0 : index
    %27 = vector.load %arg4[%c0_14, %c0_15, %c0_16] : memref<1x32x256xf32, #tpu.memory_space<vmem>>, vector<1x32x256xf32>
    tpu.vector_store %arg4[%c0_14, %c0_15, %c0_16], %26 {strides = array<i32>} : memref<1x32x256xf32, #tpu.memory_space<vmem>>, vector<1x32x256xf32>,
    return
  }
  func.func @transform_0(%arg0: i32) -> (i32, i32, i32) {
    %c0_i32 = arith.constant 0 : i32
    %c0_i32_0 = arith.constant 0 : i32
    %c0_i32_1 = arith.constant 0 : i32
    return %arg0, %c0_i32, %c0_i32_0 : i32, i32, i32
  }
  func.func @transform_1(%arg0: i32) -> (i32, i32) {
    %c0_i32 = arith.constant 0 : i32
    %c0_i32_0 = arith.constant 0 : i32
    %c0_i32_1 = arith.constant 0 : i32
    return %c0_i32, %c0_i32_0 : i32, i32
  }
  func.func @transform_2(%arg0: i32) -> (i32, i32) {
    %c0_i32 = arith.constant 0 : i32
    %c0_i32_0 = arith.constant 0 : i32
    %c0_i32_1 = arith.constant 0 : i32
    return %c0_i32, %c0_i32_0 : i32, i32
  }
  func.func @transform_3(%arg0: i32) -> (i32, i32, i32) {
    %c0_i32 = arith.constant 0 : i32
    %c0_i32_0 = arith.constant 0 : i32
    %c0_i32_1 = arith.constant 0 : i32
    return %arg0, %c0_i32, %c0_i32_0 : i32, i32, i32
  }
}

</mosaic_0001>

<bundles_post_ra>
// kernel: tpu_custom_call.1
= control target key start
LH: loop header
LB: loop body
LE: loop exit
PB: predicated region body
PF: predicated region fallthrough
CT: control target
= control target key end

     0   :  { %8 = vsyncpa [#allocation3], 0  ;;  %s823_s0 = inlined_call_operand.hbm [shape: f32[2,32,256], index: 0, kind: input, shape index: {}]   ;;  %s824_s1 = inlined_call_operand.vmem [shape: f32[32,2], index: 1, kind: input, shape index: {}]   ;;  %s825_s2 = inlined_call_operand.vmem [shape: f32[32,2], index: 2, kind: input, shape index: {}]   ;;  %s826_s3 = inlined_call_operand.hbm [shape: f32[2,32,256], index: 3, kind: output, shape index: {}]  }
   0x1   :  { %10 = vsyncpa [#allocation3 + $0x1], 0 }
   0x2   :  { %11 = vsyncpa [#allocation4], 0 }
   0x3   :  { %13 = vsyncpa [#allocation4 + $0x1], 0  ;;  %s593_s12 = smov 0   ;;  %s595_s13 = smov 0  }
   0x4   :  { %s597_s14 = smov 0   ;;  %s599_s15 = smov 0  }
   0x5 LB: > { %s614_s16 = sadd.s32 4294967295, %s565_s15   ;;  %s383_s17 = sadd.s32 4294967294, %s565_s15   ;;  %s565_s15 = sphi %s599_s15, %s839_s15   ;;  %s561_s14 = sphi %s597_s14, %s838_s14   ;;  %s557_s13 = sphi %s595_s13, %s837_s13   ;;  %s553_s12 = sphi %s593_s12, %s836_s12  }
   0x6   : > { %s618_s18 = sadd.s32 1, %s565_s15   ;;  %s26_s19 = sadd.s32 1, %s561_s14 }
   0x7   : > { %s23_s20 = ssub.s32 %s565_s15, %s618_s18  ;;  %p33_p0 = scmp.ne.s32.totalorder %s561_s14, %s557_s13 }
   0x8   : > { %p24_p1 = scmp.eq.s32.totalorder %s23_s20, 0  ;;  %p34_p2 = scmp.eq.s32.totalorder %s565_s15, 0 }
   0x9   : > { %p39_p3 = scmp.ne.s32.totalorder %s557_s13, %s553_s12  ;;  %p40_p4 = scmp.eq.s32.totalorder %s614_s16, 0 }
   0xa   : > { %s630_s21 = scalar_select %p24_p1, %s561_s14, %s26_s19  }
   0xb   : > { %p632_p5 = por %p34_p2, %p33_p0  ;;  %p636_p6 = por %p40_p4, %p39_p3 }
   0xc   : > { %p105_p7 = scmp.eq.s32.totalorder %s614_s16, 1  ;;  %p111_p8 = scmp.eq.s32.totalorder %s383_s17, 1 }
   0xd   : > { %p415_p10 = scmp.lt.s32.totalorder %s565_s15, 2  ;;  %s137_s26 = sand.u32 1, %s561_s14  }
   0xe   : > { %p643_p11 = por %p105_p7, %p33_p0  ;;  %p647_p12 = por %p111_p8, %p39_p3 }
   0xf   : > { %s401_s27 = sshll.u32 %s565_s15, 10  ;;  %s386_s28 = sshll.u32 %s137_s26, 6 }
  0x10   : > { %s830_s24 = scalar_select %p643_p11, 1, 0 }
  0x11   : > { %s831_s25 = scalar_select %p647_p12, 1, 0 }
  0x12   : > { %s656_s4 = scalar_lea.hbm %s823_s0, %s401_s27  ;;  %s141_s5 = scalar_lea.vmem [#allocation2], %s386_s28 }
  0x13   : > { %s148_s6 = sshll.u32 %s141_s5, 4  ;;  %p660_p13 = pnand %p415_p10, %p632_p5  ;;  %s664_s6 = int_to_ptr.vmem [resolvable:$true] %s148_s6 }
  0x14   : > { %s666_s8 = scalar_lea.sflag [#allocation3], %s137_s26  ;;  %s469_s9 = scalar_lea.hbm %s656_s4, 1024 }
  0x15   : > { %p470_p0 = scmp.ne.s32.totalorder %s656_s4, %s469_s9  ;;  %p471_p1 = pneg %p660_p13 }
  0x16   : > { %s474_s17 = scalar_lea.hbm %s823_s0, 2048  ;;  %p475_p4 = scmp.lt.u32.totalorder %s656_s4, %s823_s0 }
  0x17   : > { %p472_p2 = pnand %p471_p1, %p470_p0  ;;  %p476_p5 = scmp.lt.u32.totalorder %s474_s17, %s469_s9 }
  0x18   : > { %p478_p8 = scmp.lt.u32.totalorder %s469_s9, %s656_s4 }
  0x19   : > { %p473_p3 = pneg %p472_p2  ;;  %p477_p7 = por %p476_p5, %p475_p4 }
  0x1b   : > { %p479_p10 = por %p478_p8, %p477_p7 }
  0x1d   : > { %p480_p9 = pnand %p479_p10, %p473_p3 }
  0x1f   : > { %483 = shalt.err (!%p480_p9)
}
  0x20   : > { %s484_s22 = scalar_lea.vmem %s664_s6, 1024  ;;  %s567_s26 = smov [#allocation2]  }
  0x21   : > { %p485_p0 = scmp.ne.s32.totalorder %s664_s6, %s484_s22  ;;  %s489_s27 = sshll.u32 %s567_s26, 4  ;;  %s490_s27 = int_to_ptr.vmem [resolvable:$false] %s489_s27 }
  0x22   : > { %s491_s28 = scalar_lea.vmem %s490_s27, 2048  ;;  %p492_p11 = scmp.lt.s32.totalorder %s664_s6, %s490_s27 }
  0x23   : > { %p487_p2 = pnand %p485_p0, %p471_p1  ;;  %p493_p4 = scmp.lt.s32.totalorder %s491_s28, %s484_s22 }
  0x25   : > { %p488_p12 = pneg %p487_p2  ;;  %p494_p5 = por %p493_p4, %p492_p11 }
  0x27   : > { %p495_p7 = pnand %p494_p5, %p488_p12 }
  0x29   : > { %498 = shalt.err (!%p495_p7)
}
  0x2a   : > { %s568_s29 = smov 256   ;;  %s569_s30 = smov 16  }
  0x2b   : > { %410 = dma.hbm_to_vmem [thread:$0]  (!%p660_p13), %s656_s4, 1024, %s664_s6, %s666_s8, %s568_s29, %s568_s29, %s569_s30  }
  0x2c   : > { %p389_p9 = scmp.ge.s32.totalorder %s565_s15, 1  ;;  %p156_p1 = scmp.lt.s32.totalorder %s565_s15, 3 }
  0x2e   : > { %p157_p3 = pnand %p389_p9, %p156_p1 }
  0x2f   : > { %s697_s5 = sand.u32 (!%p157_p3), 1, %s557_s13  }
  0x30   : > { %160 = sbr.rel (%p157_p3) target bundleno = 423 (0x1a7), region = 32  ;;  %s390_s9 = sshll.u32 (!%p157_p3), %s697_s5, 6 }
  0x31   : > { %s163_s10 = scalar_lea.sflag (!%p157_p3), [#allocation3], %s697_s5  ;;  %s166_s11 = scalar_lea.vmem (!%p157_p3), [#allocation2], %s390_s9 }
  0x37   : > { %544 = dma.done.wait (%p636_p6), %s163_s10, 1024  }
  0x38   : > { %546 = vsyncadd (%p636_p6), %s163_s10, 4294966272  ;;  %v707_v0 = vld [vmem:[%s166_s11] sm:$0xff]  ;;  %v709_v1 = vld [vmem:[%s166_s11 + $0x8] sm:$0xff]  ;;  %vm221_vm0 = vcmask 15360   ;;  %s402_s23 = sshll.u32 %s614_s16, 10  ;;  %s188_s4 = scalar_lea.vmem [#allocation5], %s390_s9 }
  0x39   : > { %v711_v2 = vld [vmem:[%s166_s11 + $0x20] sm:$0xff]  ;;  %v197_v3 = vadd.f32 %v709_v1, %v707_v0  ;;  %v715_v4 = vld [vmem:[%s166_s11 + $0x28] sm:$0xff]  ;;  %v717_v5 = vld [vmem:[%s166_s11 + $0x10] sm:$0xff]  ;;  %s310_s6 = sshll.u32 %s188_s4, 4  ;;  %s775_s17 = scalar_lea.hbm %s826_s3, %s402_s23  ;;  %s777_s6 = int_to_ptr.vmem [resolvable:$true] %s310_s6 }
  0x3a   : > { %v719_v6 = vld [vmem:[%s166_s11 + $0x18] sm:$0xff]  ;;  %v203_v7 = vadd.f32 %v715_v4, %v711_v2  ;;  %v723_v8 = vld [vmem:[%s166_s11 + $0x30] sm:$0xff]  ;;  %v213_v15 = vld [vmem:[%s824_s1] sm:$0xff]  ;;  %s297_s16 = scalar_lea.sflag [#allocation4], %s697_s5  ;;  %s499_s9 = scalar_lea.vmem %s777_s6, 1024 }
  0x3b   : > { %v725_v9 = vld [vmem:[%s166_s11 + $0x38] sm:$0xff]  ;;  %198 = vadd.xlane.f32.xlu0 %v197_v3  ;;  %v200_v10 = vadd.f32 %v719_v6, %v717_v5  ;;  %v215_v17 = vld [vmem:[%s824_s1 + $0x10] sm:$0xff]  ;;  %v214_v18 = vld [vmem:[%s824_s1 + $0x8] sm:$0xff]  ;;  %p500_p6 = scmp.ne.s32.totalorder %s777_s6, %s499_s9  ;;  %p833_p11 = scmp.ne.s32.totalorder %s830_s24, 0 }
  0x3c   : > { %204 = vadd.xlane.f32.xlu1 %v203_v7  ;;  %v206_v11 = vadd.f32 %v725_v9, %v723_v8  ;;  %v216_v22 = vld [vmem:[%s824_s1 + $0x18] sm:$0xff]  ;;  %v237_v41 = vld [vmem:[%s825_s2 + $0x8] sm:$0xff]  ;;  %v236_v42 = vld [vmem:[%s825_s2] sm:$0xff]  ;;  %s570_s19 = smov [#allocation5]  }
  0x3d   : > { %v239_v44 = vld [vmem:[%s825_s2 + $0x18] sm:$0xff]  ;;  %v238_v45 = vld [vmem:[%s825_s2 + $0x10] sm:$0xff]  ;;  %p501_p12 = pnand %p500_p6, %p833_p11  ;;  %s503_s20 = sshll.u32 %s570_s19, 4  ;;  %s504_s20 = int_to_ptr.vmem [resolvable:$false] %s503_s20 }
  0x3e   : > { %s505_s22 = scalar_lea.vmem %s504_s20, 2048  ;;  %p506_p8 = scmp.lt.s32.totalorder %s777_s6, %s504_s20 }
  0x3f   : > { %201 = vadd.xlane.f32.xlu0 %v200_v10  ;;  %p502_p13 = pneg %p501_p12  ;;  %p507_p10 = scmp.lt.s32.totalorder %s505_s22, %s499_s9 }
  0x40   : > { %207 = vadd.xlane.f32.xlu1 %v206_v11 }
  0x41   : > { %p508_p0 = por %p507_p10, %p506_p8 }
  0x43   : > { %p509_p2 = pnand %p508_p0, %p502_p13 }
  0xc8   : > { %v199_v12 = vpop.xlane.xlu0 %198 }
  0xc9   : > { %v209_v13 = vmul.f32 0.00390625, %v199_v12  ;;  %v205_v14 = vpop.xlane.xlu1 %204 }
  0xca   : > { %v211_v16 = vmul.f32 0.00390625, %v205_v14 }
  0xcb   : > { %v217_v20 = vmul.f32 %v213_v15, %v209_v13 }
  0xcc   : > { %v202_v19 = vpop.xlane.xlu0 %201  ;;  %v219_v25 = vmul.f32 %v215_v17, %v211_v16 }
  0xcd   : > { %v210_v21 = vmul.f32 0.00390625, %v202_v19  ;;  %v208_v23 = vpop.xlane.xlu1 %207  ;;  %v222_v28 = vsel %vm221_vm0, %v217_v20, 0.0 }
  0xce   : > { %v212_v24 = vmul.f32 0.00390625, %v208_v23  ;;  %v225_v31 = vsel %vm221_vm0, %v219_v25, 0.0 }
  0xcf   : > { %v218_v26 = vmul.f32 %v214_v18, %v210_v21 }
  0xd0   : > { %v220_v27 = vmul.f32 %v216_v22, %v212_v24 }
  0xd1   : > { %v223_v29 = vsel %vm221_vm0, %v218_v26, 0.0 }
  0xd2   : > { %v224_v30 = vadd.f32 %v223_v29, %v222_v28  ;;  %v227_v32 = vsel %vm221_vm0, %v220_v27, 0.0 }
  0xd4   : > { %v226_v33 = vadd.f32 %v225_v31, %v224_v30 }
  0xd6   : > { %v228_v34 = vadd.f32 %v227_v32, %v226_v33 }
  0xd8   : > { %v229_v35 = vrot.slane %v228_v34, 4 }
  0xda   : > { %v230_v36 = vadd.f32 %v229_v35, %v228_v34 }
  0xdc   : > { %v231_v37 = vrot.slane %v230_v36, 2 }
  0xde   : > { %v232_v38 = vadd.f32 %v231_v37, %v230_v36 }
  0xe0   : > { %v233_v39 = vrot.slane %v232_v38, 1 }
  0xe2   : > { %v234_v40 = vadd.f32 %v233_v39, %v232_v38 }
  0xe4   : > { %v235_v43 = vmax.f32 %v234_v40, 0.0 }
  0xe6   : > { %v241_v46 = vmul.f32 %v237_v41, %v235_v43  ;;  %v240_v47 = vmul.f32 %v236_v42, %v235_v43  ;;  %v243_v50 = vmul.f32 %v239_v44, %v235_v43  ;;  %v242_v51 = vmul.f32 %v238_v45, %v235_v43 }
  0xe8   : > { %v247_v48 = vsel %vm221_vm0, %v241_v46, 0.0  ;;  %v244_v49 = vsel %vm221_vm0, %v240_v47, 0.0  ;;  %v253_v52 = vsel %vm221_vm0, %v243_v50, 0.0  ;;  %v250_v53 = vsel %vm221_vm0, %v242_v51, 0.0 }
  0xe9   : > { %248 = vadd.xlane.f32.xlu1 %v247_v48  ;;  %245 = vadd.xlane.f32.xlu0 %v244_v49 }
  0xed   : > { %254 = vadd.xlane.f32.xlu1 %v253_v52  ;;  %251 = vadd.xlane.f32.xlu0 %v250_v53 }
 0x176   : > { %v249_v54 = vpop.xlane.xlu1 %248  ;;  %v246_v55 = vpop.xlane.xlu0 %245 }
 0x177   : > { %v393_v56 = vmul.f32 -1.442695, %v249_v54  ;;  %v392_v57 = vmul.f32 -1.442695, %v246_v55 }
 0x179   : > { %453 = vpow2.f32 %v393_v56 }
 0x17a   : > { %455 = vpow2.f32 %v392_v57  ;;  %v255_v58 = vpop.xlane.xlu1 %254  ;;  %v252_v59 = vpop.xlane.xlu0 %251 }
 0x17b   : > { %v395_v60 = vmul.f32 -1.442695, %v255_v58  ;;  %v394_v61 = vmul.f32 -1.442695, %v252_v59 }
 0x17d   : > { %457 = vpow2.f32 %v395_v60 }
 0x17e   : > { %459 = vpow2.f32 %v394_v61 }
 0x183   : > { %v454_v62 = vpop.eup %453 }
 0x184   : > { %v456_v63 = vpop.eup %455  ;;  %v269_v3 = vadd.f32 1.0, %v454_v62 }
 0x185   : > { %v268_v7 = vadd.f32 1.0, %v456_v63 }
 0x186   : > { %461 = vrcp.f32 %v269_v3 }
 0x187   : > { %v458_v10 = vpop.eup %457  ;;  %463 = vrcp.f32 %v268_v7 }
 0x188   : > { %v460_v11 = vpop.eup %459  ;;  %v271_v12 = vadd.f32 1.0, %v458_v10 }
 0x189   : > { %v270_v13 = vadd.f32 1.0, %v460_v11 }
 0x18a   : > { %465 = vrcp.f32 %v271_v12 }
 0x18b   : > { %467 = vrcp.f32 %v270_v13 }
 0x190   : > { %v462_v14 = vpop.eup %461 }
 0x191   : > { %v464_v15 = vpop.eup %463  ;;  %v282_v16 = vmul.f32 %v462_v14, %v717_v5  ;;  %v283_v17 = vmul.f32 %v462_v14, %v719_v6 }
 0x192   : > { %v280_v18 = vmul.f32 %v464_v15, %v707_v0  ;;  %v281_v19 = vmul.f32 %v464_v15, %v709_v1 }
 0x193   : > { %290 = vst [vmem:[%s188_s4 + $0x10] sm:$0xff] %v282_v16  ;;  %291 = vst [vmem:[%s188_s4 + $0x18] sm:$0xff] %v283_v17 }
 0x194   : > { %v466_v20 = vpop.eup %465  ;;  %288 = vst [vmem:[%s188_s4] sm:$0xff] %v280_v18  ;;  %289 = vst [vmem:[%s188_s4 + $0x8] sm:$0xff] %v281_v19 }
 0x195   : > { %v468_v21 = vpop.eup %467  ;;  %v286_v5 = vmul.f32 %v466_v20, %v723_v8  ;;  %v287_v6 = vmul.f32 %v466_v20, %v725_v9 }
 0x196   : > { %v284_v0 = vmul.f32 %v468_v21, %v711_v2  ;;  %v285_v1 = vmul.f32 %v468_v21, %v715_v4 }
 0x197   : > { %294 = vst [vmem:[%s188_s4 + $0x30] sm:$0xff] %v286_v5  ;;  %295 = vst [vmem:[%s188_s4 + $0x38] sm:$0xff] %v287_v6 }
 0x198   : > { %292 = vst [vmem:[%s188_s4 + $0x20] sm:$0xff] %v284_v0  ;;  %293 = vst [vmem:[%s188_s4 + $0x28] sm:$0xff] %v285_v1 }
 0x199   : > { %512 = shalt.err (!%p509_p2)
}
 0x19a   : > { %s513_s26 = scalar_lea.hbm %s775_s17, 1024  ;;  %s517_s29 = scalar_lea.hbm %s826_s3, 2048 }
 0x19b   : > { %p514_p4 = scmp.ne.s32.totalorder %s775_s17, %s513_s26  ;;  %p518_p9 = scmp.lt.u32.totalorder %s775_s17, %s826_s3 }
 0x19c   : > { %p519_p1 = scmp.lt.u32.totalorder %s517_s29, %s513_s26  ;;  %p521_p6 = scmp.lt.u32.totalorder %s513_s26, %s775_s17 }
 0x19d   : > { %p515_p5 = pnand %p514_p4, %p833_p11 }
 0x19e   : > { %p520_p3 = por %p519_p1, %p518_p9 }
 0x19f   : > { %p516_p7 = pneg %p515_p5 }
 0x1a0   : > { %p522_p12 = por %p521_p6, %p520_p3 }
 0x1a2   : > { %p523_p13 = pnand %p522_p12, %p516_p7 }
 0x1a4   : > { %526 = shalt.err (!%p523_p13)
}
 0x1a5   : > { %s571_s11 = smov 256   ;;  %s572_s23 = smov 16  }
 0x1a6   : > { %405 = dma.vmem_to_hbm [thread:$0]  (%p833_p11), %s777_s6, 1024, %s775_s17, %s297_s16, %s571_s11, %s571_s11, %s572_s23  }
 0x1a7 PF: > { %s325_s4 = sand.u32 1, %s553_s12   ;;  %p834_p8 = scmp.ne.s32.totalorder %s831_s25, 0 }
 0x1a8   : > { %p835_p10 = scmp.ge.s32.totalorder %s565_s15, 2  ;;  %s326_s7 = scalar_lea.sflag [#allocation4], %s325_s4 }
 0x1aa   : > { %p412_p0 = pnand %p835_p10, %p834_p8 }
 0x1ac   : > { %548 = dma.done.wait (!%p412_p0), %s326_s7, 1024  }
 0x1ad   : > { %550 = vsyncadd (!%p412_p0), %s326_s7, 4294966272  ;;  %p16_p2 = scmp.ge.s32.totalorder %s618_s18, 4   ;;  %s836_s12 = smov %s557_s13 }
 0x1ae   : > { %s837_s13 = smov %s561_s14  ;;  %s838_s14 = smov %s630_s21 }
 0x1af   : > { %s839_s15 = smov %s618_s18  ;;  %18 = sbr.rel (!%p16_p2) target bundleno = 5 (0x5), region = 77 }
 0x1b6   :  { %331 = vsyncpa [#allocation3], 1 }
 0x1b7   :  { %333 = vsyncpa [#allocation3 + $0x1], 1 }
 0x1b8   :  { %334 = vsyncpa [#allocation4], 1 }
 0x1b9   :  { %336 = vsyncpa [#allocation4 + $0x1], 1 }

</bundles_post_ra>
